<compile_context>
chip_gen: v5e
topology: v5e:2x2
jax: 0.10.0
libtpu: 0.0.40
codegen_flags: <defaults>
</compile_context>

<pallas_src>
import functools

import jax
import jax.numpy as jnp
from jax.experimental import pallas as pl
from jax.experimental.pallas import tpu as pltpu

_LANE = 128


def _round_up(n, m):
    return ((n + m - 1) // m) * m


def _leaky_relu(h, slope=0.1):
    return jnp.where(h >= 0, h, slope * h)


def discriminator_kernel(x_ref, w1_ref, wh_ref, bh_ref, w5_ref, b5_ref, o_ref):
    """Fused forward: 4x (Linear + LeakyReLU) -> Linear -> sigmoid.

    All matmuls hit the MXU with f32 accumulation; activations stay in
    vregs/VMEM between layers (no HBM round-trips). Weights/biases are
    VMEM-resident across every batch-grid step.
    """
    wdt = w1_ref.dtype

    # Layer 1: [TB, F] @ [F, HP]
    h = jnp.dot(x_ref[...].astype(wdt), w1_ref[...],
                preferred_element_type=jnp.float32)
    h = _leaky_relu(h + bh_ref[0][None, :])

    # Layers 2-4: [TB, HP] @ [HP, HP]  (static unroll)
    for l in range(3):
        h = jnp.dot(h.astype(wdt), wh_ref[l],
                    preferred_element_type=jnp.float32)
        h = _leaky_relu(h + bh_ref[l + 1][None, :])

    # Output layer: [TB, HP] @ [HP, OP] + sigmoid  (OP is lane-dense, 128-wide)
    logits = jnp.dot(h.astype(wdt), w5_ref[...],
                     preferred_element_type=jnp.float32) + b5_ref[...]
    o_ref[...] = jax.nn.sigmoid(logits).astype(o_ref.dtype)


def _pad2(w, rows, cols):
    return jnp.pad(w, ((0, rows - w.shape[0]), (0, cols - w.shape[1])))


def _pad1(b, cols):
    b = b.reshape(-1)
    return jnp.pad(b, (0, cols - b.shape[0]))


@functools.partial(jax.jit, static_argnames=("weights_dtype", "block_b"))
def discriminator_forward(x, params, *, weights_dtype=jnp.float32,
                          block_b=1024):
    """x: [B, input_neurons] f32. params: 5x (W [in, out], b [out])."""
    B, F = x.shape
    hidden = params[0][0].shape[1]
    out_n = params[-1][0].shape[1]
    HP = _round_up(hidden, _LANE)   # lane-dense hidden width
    OP = _round_up(out_n, _LANE)    # lane-dense output width

    (w1, b1), (w2, b2), (w3, b3), (w4, b4), (w5, b5) = params

    # Zero padding keeps padded lanes exactly 0 through LeakyReLU, so the
    # logical result is unchanged; the wrapper slices it back out below.
    w1p = _pad2(w1, F, HP).astype(weights_dtype)
    whp = jnp.stack([_pad2(w, HP, HP) for w in (w2, w3, w4)]).astype(weights_dtype)
    bhp = jnp.stack([_pad1(b, HP) for b in (b1, b2, b3, b4)]).astype(jnp.float32)
    w5p = _pad2(w5, HP, OP).astype(weights_dtype)
    b5p = _pad1(b5, OP).reshape(1, OP).astype(jnp.float32)

    # Batch tiling: largest tile <= block_b that divides the (padded) batch.
    TB = min(block_b, _round_up(B, 8))
    B_pad = _round_up(B, TB)
    if B_pad != B:
        x = jnp.pad(x, ((0, B_pad - B), (0, 0)))
    grid = (B_pad // TB,)

    wbytes = jnp.dtype(weights_dtype).itemsize
    cost = pl.CostEstimate(
        flops=2 * B_pad * (F * HP + 3 * HP * HP + HP * OP),
        transcendentals=B_pad * OP,                                  # sigmoid
        bytes_accessed=(B_pad * F * 4                                # x
                        + (F * HP + 3 * HP * HP + HP * OP) * wbytes  # weights
                        + (4 * HP + OP) * 4                          # biases
                        + B_pad * OP * 4),                           # output
    )

    out_padded = pl.pallas_call(
        discriminator_kernel,
        out_shape=jax.ShapeDtypeStruct((B_pad, OP), jnp.float32),
        grid=grid,
        in_specs=[
            pl.BlockSpec((TB, F), lambda i: (i, 0)),         # x: tiled on batch
            pl.BlockSpec((F, HP), lambda i: (0, 0)),         # w1: resident
            pl.BlockSpec((3, HP, HP), lambda i: (0, 0, 0)),  # w2..w4: resident
            pl.BlockSpec((4, HP), lambda i: (0, 0)),         # b1..b4: resident
            pl.BlockSpec((HP, OP), lambda i: (0, 0)),        # w5: resident
            pl.BlockSpec((1, OP), lambda i: (0, 0)),         # b5: resident
        ],
        out_specs=pl.BlockSpec((TB, OP), lambda i: (i, 0)),  # lane-dense out
        compiler_params=pltpu.CompilerParams(
            dimension_semantics=("parallel",)),
        cost_estimate=cost,
    )(x, w1p, whp, bhp, w5p, b5p)

    return out_padded[:B, :out_n]


def init_params(key, input_neurons, hidden_neurons, output_neurons):
    """Deterministic synthetic init (uniform, nn.Linear-style scaling).

    Weights stored [in_features, out_features] (transposed vs. PyTorch)."""
    dims = [
        (input_neurons, hidden_neurons),   # hidden
        (hidden_neurons, hidden_neurons),  # hiddenM1
        (hidden_neurons, hidden_neurons),  # hiddenM2
        (hidden_neurons, hidden_neurons),  # hiddenM3
        (hidden_neurons, output_neurons),  # out
    ]
    params = []
    for (fan_in, fan_out) in dims:
        key, kw, kb = jax.random.split(key, 3)
        bound = 1.0 / jnp.sqrt(jnp.float32(fan_in))
        w = jax.random.uniform(kw, (fan_in, fan_out), jnp.float32, -bound, bound)
        b = jax.random.uniform(kb, (fan_out,), jnp.float32, -bound, bound)
        params.append((w, b))
    return params


def reference_forward(x, params):
    """Plain-JAX f32 reference matching the PyTorch forward()."""
    h = x
    for (w, b) in params[:-1]:
        h = h @ w + b
        h = jnp.where(h >= 0, h, 0.1 * h)
    w, b = params[-1]
    return jax.nn.sigmoid(h @ w + b)


if __name__ == "__main__":
    input_neurons, hidden_neurons, output_neurons = 16, 32, 1
    batch = 16

    key = jax.random.PRNGKey(0)
    key, kx = jax.random.split(key)
    x = jax.random.normal(kx, (batch, input_neurons), jnp.float32)
    params = init_params(key, input_neurons, hidden_neurons, output_neurons)

    ref = reference_forward(x, params)

    # f32 weights, small tile so the batch grid has >1 step (exercises tiling).
    out_f32 = jax.block_until_ready(
        discriminator_forward(x, params, weights_dtype=jnp.float32, block_b=8))
    assert out_f32.shape == (batch, output_neurons)
    assert jnp.allclose(out_f32, ref, atol=1e-5, rtol=1e-5)

    # bf16 weights/activations on the MXU (f32 accumulation), default tiling.
    out_bf16 = jax.block_until_ready(
        discriminator_forward(x, params, weights_dtype=jnp.bfloat16))
    assert out_bf16.shape == (batch, output_neurons)
    assert jnp.allclose(out_bf16, ref, atol=5e-2, rtol=5e-2)

    print("KERNEL_OK")
</pallas_src>

<mosaic_0001>
module attributes {stable_mosaic.version = 11 : i64} {
  func.func @discriminator_kernel(%arg0: i32, %arg1: memref<8x16xf32, #tpu.memory_space<vmem>>, %arg2: memref<16x128xf32, #tpu.memory_space<vmem>>, %arg3: memref<3x128x128xf32, #tpu.memory_space<vmem>>, %arg4: memref<4x128xf32, #tpu.memory_space<vmem>>, %arg5: memref<128x128xf32, #tpu.memory_space<vmem>>, %arg6: memref<1x128xf32, #tpu.memory_space<vmem>>, %arg7: memref<8x128xf32, #tpu.memory_space<vmem>>) attributes {dimension_semantics = [#tpu.dimension_semantics<parallel>], iteration_bounds = array<i64: 2>, scalar_prefetch = 0 : i64, scratch_operands = 0 : i64, tpu.core_type = #tpu.core_type<tc>, window_params = [{transform_indices = @transform_0, window_bounds = array<i64: 8, 16>}, {pipeline_mode = #tpu.pipeline_mode<synchronous>, transform_indices = @transform_1, window_bounds = array<i64: 16, 128>}, {pipeline_mode = #tpu.pipeline_mode<synchronous>, transform_indices = @transform_2, window_bounds = array<i64: 3, 128, 128>}, {pipeline_mode = #tpu.pipeline_mode<synchronous>, transform_indices = @transform_3, window_bounds = array<i64: 4, 128>}, {pipeline_mode = #tpu.pipeline_mode<synchronous>, transform_indices = @transform_4, window_bounds = array<i64: 128, 128>}, {pipeline_mode = #tpu.pipeline_mode<synchronous>, transform_indices = @transform_5, window_bounds = array<i64: 1, 128>}, {transform_indices = @transform_6, window_bounds = array<i64: 8, 128>}]} {
    %c0 = arith.constant 0 : index
    %c0_0 = arith.constant 0 : index
    %0 = vector.load %arg1[%c0, %c0_0] : memref<8x16xf32, #tpu.memory_space<vmem>>, vector<8x16xf32>
    %c0_1 = arith.constant 0 : index
    %c0_2 = arith.constant 0 : index
    %1 = vector.load %arg2[%c0_1, %c0_2] : memref<16x128xf32, #tpu.memory_space<vmem>>, vector<16x128xf32>
    %cst = arith.constant dense<0.000000e+00> : vector<8x128xf32>
    %2 = tpu.matmul %0, %1, %cst {dimension_numbers = #tpu.dot_dimension_numbers<[1], [0], [0], [1], [0, 0, 1, 1], [], []>} : vector<8x16xf32>, vector<16x128xf32>, vector<8x128xf32> -> vector<8x128xf32>
    %c0_3 = arith.constant 0 : index
    %c0_4 = arith.constant 0 : index
    %3 = vector.load %arg4[%c0_3, %c0_4] : memref<4x128xf32, #tpu.memory_space<vmem>>, vector<1x128xf32>
    %4 = vector.shape_cast %3 : vector<1x128xf32> to vector<128xf32>
    %5 = vector.shape_cast %4 : vector<128xf32> to vector<1x128xf32>
    %6 = vector.broadcast %5 : vector<1x128xf32> to vector<8x128xf32>
    %7 = arith.addf %2, %6 : vector<8x128xf32>
    %cst_5 = arith.constant 0.000000e+00 : f32
    %8 = vector.broadcast %cst_5 : f32 to vector<8x128xf32>
    %9 = arith.cmpf oge, %7, %8 : vector<8x128xf32>
    %cst_6 = arith.constant 1.000000e-01 : f32
    %10 = vector.broadcast %cst_6 : f32 to vector<8x128xf32>
    %11 = arith.mulf %10, %7 : vector<8x128xf32>
    %12 = arith.select %9, %7, %11 : vector<8x128xi1>, vector<8x128xf32>
    %c0_7 = arith.constant 0 : index
    %c0_8 = arith.constant 0 : index
    %c0_9 = arith.constant 0 : index
    %13 = vector.load %arg3[%c0_7, %c0_8, %c0_9] : memref<3x128x128xf32, #tpu.memory_space<vmem>>, vector<1x128x128xf32>
    %14 = vector.shape_cast %13 : vector<1x128x128xf32> to vector<128x128xf32>
    %cst_10 = arith.constant dense<0.000000e+00> : vector<8x128xf32>
    %15 = tpu.matmul %12, %14, %cst_10 {dimension_numbers = #tpu.dot_dimension_numbers<[1], [0], [0], [1], [0, 0, 1, 1], [], []>} : vector<8x128xf32>, vector<128x128xf32>, vector<8x128xf32> -> vector<8x128xf32>
    %c1 = arith.constant 1 : index
    %c0_11 = arith.constant 0 : index
    %16 = vector.load %arg4[%c1, %c0_11] : memref<4x128xf32, #tpu.memory_space<vmem>>, vector<1x128xf32>
    %17 = vector.shape_cast %16 : vector<1x128xf32> to vector<128xf32>
    %18 = vector.shape_cast %17 : vector<128xf32> to vector<1x128xf32>
    %19 = vector.broadcast %18 : vector<1x128xf32> to vector<8x128xf32>
    %20 = arith.addf %15, %19 : vector<8x128xf32>
    %cst_12 = arith.constant 0.000000e+00 : f32
    %21 = vector.broadcast %cst_12 : f32 to vector<8x128xf32>
    %22 = arith.cmpf oge, %20, %21 : vector<8x128xf32>
    %cst_13 = arith.constant 1.000000e-01 : f32
    %23 = vector.broadcast %cst_13 : f32 to vector<8x128xf32>
    %24 = arith.mulf %23, %20 : vector<8x128xf32>
    %25 = arith.select %22, %20, %24 : vector<8x128xi1>, vector<8x128xf32>
    %c1_14 = arith.constant 1 : index
    %c0_15 = arith.constant 0 : index
    %c0_16 = arith.constant 0 : index
    %26 = vector.load %arg3[%c1_14, %c0_15, %c0_16] : memref<3x128x128xf32, #tpu.memory_space<vmem>>, vector<1x128x128xf32>
    %27 = vector.shape_cast %26 : vector<1x128x128xf32> to vector<128x128xf32>
    %cst_17 = arith.constant dense<0.000000e+00> : vector<8x128xf32>
    %28 = tpu.matmul %25, %27, %cst_17 {dimension_numbers = #tpu.dot_dimension_numbers<[1], [0], [0], [1], [0, 0, 1, 1], [], []>} : vector<8x128xf32>, vector<128x128xf32>, vector<8x128xf32> -> vector<8x128xf32>
    %c2 = arith.constant 2 : index
    %c0_18 = arith.constant 0 : index
    %29 = vector.load %arg4[%c2, %c0_18] : memref<4x128xf32, #tpu.memory_space<vmem>>, vector<1x128xf32>
    %30 = vector.shape_cast %29 : vector<1x128xf32> to vector<128xf32>
    %31 = vector.shape_cast %30 : vector<128xf32> to vector<1x128xf32>
    %32 = vector.broadcast %31 : vector<1x128xf32> to vector<8x128xf32>
    %33 = arith.addf %28, %32 : vector<8x128xf32>
    %cst_19 = arith.constant 0.000000e+00 : f32
    %34 = vector.broadcast %cst_19 : f32 to vector<8x128xf32>
    %35 = arith.cmpf oge, %33, %34 : vector<8x128xf32>
    %cst_20 = arith.constant 1.000000e-01 : f32
    %36 = vector.broadcast %cst_20 : f32 to vector<8x128xf32>
    %37 = arith.mulf %36, %33 : vector<8x128xf32>
    %38 = arith.select %35, %33, %37 : vector<8x128xi1>, vector<8x128xf32>
    %c2_21 = arith.constant 2 : index
    %c0_22 = arith.constant 0 : index
    %c0_23 = arith.constant 0 : index
    %39 = vector.load %arg3[%c2_21, %c0_22, %c0_23] : memref<3x128x128xf32, #tpu.memory_space<vmem>>, vector<1x128x128xf32>
    %40 = vector.shape_cast %39 : vector<1x128x128xf32> to vector<128x128xf32>
    %cst_24 = arith.constant dense<0.000000e+00> : vector<8x128xf32>
    %41 = tpu.matmul %38, %40, %cst_24 {dimension_numbers = #tpu.dot_dimension_numbers<[1], [0], [0], [1], [0, 0, 1, 1], [], []>} : vector<8x128xf32>, vector<128x128xf32>, vector<8x128xf32> -> vector<8x128xf32>
    %c3 = arith.constant 3 : index
    %c0_25 = arith.constant 0 : index
    %42 = vector.load %arg4[%c3, %c0_25] : memref<4x128xf32, #tpu.memory_space<vmem>>, vector<1x128xf32>
    %43 = vector.shape_cast %42 : vector<1x128xf32> to vector<128xf32>
    %44 = vector.shape_cast %43 : vector<128xf32> to vector<1x128xf32>
    %45 = vector.broadcast %44 : vector<1x128xf32> to vector<8x128xf32>
    %46 = arith.addf %41, %45 : vector<8x128xf32>
    %cst_26 = arith.constant 0.000000e+00 : f32
    %47 = vector.broadcast %cst_26 : f32 to vector<8x128xf32>
    %48 = arith.cmpf oge, %46, %47 : vector<8x128xf32>
    %cst_27 = arith.constant 1.000000e-01 : f32
    %49 = vector.broadcast %cst_27 : f32 to vector<8x128xf32>
    %50 = arith.mulf %49, %46 : vector<8x128xf32>
    %51 = arith.select %48, %46, %50 : vector<8x128xi1>, vector<8x128xf32>
    %c0_28 = arith.constant 0 : index
    %c0_29 = arith.constant 0 : index
    %52 = vector.load %arg5[%c0_28, %c0_29] : memref<128x128xf32, #tpu.memory_space<vmem>>, vector<128x128xf32>
    %cst_30 = arith.constant dense<0.000000e+00> : vector<8x128xf32>
    %53 = tpu.matmul %51, %52, %cst_30 {dimension_numbers = #tpu.dot_dimension_numbers<[1], [0], [0], [1], [0, 0, 1, 1], [], []>} : vector<8x128xf32>, vector<128x128xf32>, vector<8x128xf32> -> vector<8x128xf32>
    %c0_31 = arith.constant 0 : index
    %c0_32 = arith.constant 0 : index
    %54 = vector.load %arg6[%c0_31, %c0_32] : memref<1x128xf32, #tpu.memory_space<vmem>>, vector<1x128xf32>
    %55 = vector.broadcast %54 : vector<1x128xf32> to vector<8x128xf32>
    %56 = arith.addf %53, %55 : vector<8x128xf32>
    %57 = arith.negf %56 : vector<8x128xf32>
    %58 = math.exp %57 : vector<8x128xf32>
    %cst_33 = arith.constant 1.000000e+00 : f32
    %59 = vector.broadcast %cst_33 : f32 to vector<8x128xf32>
    %60 = arith.addf %59, %58 : vector<8x128xf32>
    %61 = arith.divf %59, %60 : vector<8x128xf32>
    %c0_34 = arith.constant 0 : index
    %c0_35 = arith.constant 0 : index
    %62 = vector.load %arg7[%c0_34, %c0_35] : memref<8x128xf32, #tpu.memory_space<vmem>>, vector<8x128xf32>
    tpu.vector_store %arg7[%c0_34, %c0_35], %61 {strides = array<i32>} : memref<8x128xf32, #tpu.memory_space<vmem>>, vector<8x128xf32>,
    return
  }
  func.func @transform_0(%arg0: i32) -> (i32, i32) {
    %c0_i32 = arith.constant 0 : i32
    %c0_i32_0 = arith.constant 0 : i32
    return %arg0, %c0_i32 : i32, i32
  }
  func.func @transform_1(%arg0: i32) -> (i32, i32) {
    %c0_i32 = arith.constant 0 : i32
    %c0_i32_0 = arith.constant 0 : i32
    %c0_i32_1 = arith.constant 0 : i32
    return %c0_i32, %c0_i32_0 : i32, i32
  }
  func.func @transform_2(%arg0: i32) -> (i32, i32, i32) {
    %c0_i32 = arith.constant 0 : i32
    %c0_i32_0 = arith.constant 0 : i32
    %c0_i32_1 = arith.constant 0 : i32
    %c0_i32_2 = arith.constant 0 : i32
    return %c0_i32, %c0_i32_0, %c0_i32_1 : i32, i32, i32
  }
  func.func @transform_3(%arg0: i32) -> (i32, i32) {
    %c0_i32 = arith.constant 0 : i32
    %c0_i32_0 = arith.constant 0 : i32
    %c0_i32_1 = arith.constant 0 : i32
    return %c0_i32, %c0_i32_0 : i32, i32
  }
  func.func @transform_4(%arg0: i32) -> (i32, i32) {
    %c0_i32 = arith.constant 0 : i32
    %c0_i32_0 = arith.constant 0 : i32
    %c0_i32_1 = arith.constant 0 : i32
    return %c0_i32, %c0_i32_0 : i32, i32
  }
  func.func @transform_5(%arg0: i32) -> (i32, i32) {
    %c0_i32 = arith.constant 0 : i32
    %c0_i32_0 = arith.constant 0 : i32
    %c0_i32_1 = arith.constant 0 : i32
    return %c0_i32, %c0_i32_0 : i32, i32
  }
  func.func @transform_6(%arg0: i32) -> (i32, i32) {
    %c0_i32 = arith.constant 0 : i32
    %c0_i32_0 = arith.constant 0 : i32
    return %arg0, %c0_i32 : i32, i32
  }
}

</mosaic_0001>

<bundles_post_ra>
// kernel: discriminator_forward.1
= control target key start
LH: loop header
LB: loop body
LE: loop exit
PB: predicated region body
PF: predicated region fallthrough
CT: control target
= control target key end

     0   :  { %s620_s21 = smov 0   ;;  %s857_s0 = inlined_call_operand.vmem [shape: f32[16,16], index: 0, kind: input, shape index: {}]   ;;  %s858_s1 = inlined_call_operand.vmem [shape: f32[16,128], index: 1, kind: input, shape index: {}]   ;;  %s859_s2 = inlined_call_operand.vmem [shape: f32[3,128,128], index: 2, kind: input, shape index: {}]   ;;  %s860_s3 = inlined_call_operand.vmem [shape: f32[4,128], index: 3, kind: input, shape index: {}]   ;;  %s861_s4 = inlined_call_operand.vmem [shape: f32[128,128], index: 4, kind: input, shape index: {}]   ;;  %s862_s5 = inlined_call_operand.vmem [shape: f32[1,128], index: 5, kind: input, shape index: {}]   ;;  %s863_s6 = inlined_call_operand.vmem [shape: f32[16,128], index: 6, kind: output, shape index: {}]  }
   0x1 LB: > { %s517_s22 = sadd.s32 4294967295, %s583_s21   ;;  %p521_p0 = scmp.ge.s32.totalorder %s583_s21, 1  ;;  %s583_s21 = sphi %s620_s21, %s16_s21  }
   0x2   : > { %p211_p1 = scmp.lt.s32.totalorder %s583_s21, 3 }
   0x4   : > { %p212_p2 = pnand %p521_p0, %p211_p1 }
   0x5   : > { %p239_p3 = scmp.lt.s32.totalorder (!%p212_p2), %s517_s22, 1 }
   0x6   : > { %215 = sbr.rel (%p212_p2) target bundleno = 708 (0x2c4), region = 44 }
   0xb   : > { %v249_v0 = vld [vmem:[%s858_s1 + $0x8] sm:$0xff]  ;;  %v248_v1 = vld [vmem:[%s858_s1] sm:$0xff]  ;;  %v294_v2 = vld [vmem:[%s859_s2 + $0x78] sm:$0xff]  ;;  %s865_s22 = smov (!%p239_p3, %s517_s22), 1  ;;  %vm252_vm0 = vcmask 130048  }
   0xc   : > { %270 = vmatpush.msra.mxu0 %v249_v0  ;;  %297 = vmatpush.msra.mxu1 %v294_v2  ;;  %v293_v3 = vld [vmem:[%s859_s2 + $0x70] sm:$0xff]  ;;  %v292_v4 = vld [vmem:[%s859_s2 + $0x68] sm:$0xff]  ;;  %s522_s9 = sshll.u32 %s865_s22, 3  ;;  %v291_v5 = vld [vmem:[%s859_s2 + $0x60] sm:$0xff] }
   0xd   : > { %s242_s14 = scalar_lea.vmem %s857_s0, %s522_s9  ;;  %v290_v6 = vld [vmem:[%s859_s2 + $0x58] sm:$0xff]  ;;  %v289_v8 = vld [vmem:[%s859_s2 + $0x50] sm:$0xff]  ;;  %v288_v9 = vld [vmem:[%s859_s2 + $0x48] sm:$0xff]  ;;  %s246_s23 = scalar_lea.vmem %s863_s6, %s522_s9 }
   0xe   : > { %271 = vmatpush.msra.mxu0 %v248_v1  ;;  %298 = vmatpush.msra.mxu1 %v293_v3  ;;  %v247_v7 = vld [vmem:[%s242_s14] sm:$0xff]  ;;  %v286_v11 = vld [vmem:[%s859_s2 + $0x38] sm:$0xff]  ;;  %v285_v12 = vld [vmem:[%s859_s2 + $0x30] sm:$0xff] }
   0xf   : > { %524 = vmatmul.msk.f32.vlgmr.msra.gmra.mxu0 %vm252_vm0, %v247_v7  ;;  %v287_v10 = vld [vmem:[%s859_s2 + $0x40] sm:$0xff]  ;;  %v284_v13 = vld [vmem:[%s859_s2 + $0x28] sm:$0xff]  ;;  %v282_v15 = vld [vmem:[%s859_s2 + $0x18] sm:$0xff] }
  0x10   : > { %299 = vmatpush.msra.mxu1 %v292_v4  ;;  %v283_v14 = vld [vmem:[%s859_s2 + $0x20] sm:$0xff]  ;;  %v281_v16 = vld [vmem:[%s859_s2 + $0x10] sm:$0xff]  ;;  %v280_v17 = vld [vmem:[%s859_s2 + $0x8] sm:$0xff] }
  0x11   : > { %v279_v18 = vld [vmem:[%s859_s2] sm:$0xff]  ;;  %v540_v19 = vld [vmem:[%s859_s2 + $0xf8] sm:$0xff]  ;;  %v539_v20 = vld [vmem:[%s859_s2 + $0xf0] sm:$0xff] }
  0x12   : > { %300 = vmatpush.msra.mxu1 %v291_v5  ;;  %339 = vmatpush.msra.mxu2 %v540_v19  ;;  %v538_v21 = vld [vmem:[%s859_s2 + $0xe8] sm:$0xff]  ;;  %v537_v22 = vld [vmem:[%s859_s2 + $0xe0] sm:$0xff]  ;;  %v536_v23 = vld [vmem:[%s859_s2 + $0xd8] sm:$0xff] }
  0x13   : > { %v535_v24 = vld [vmem:[%s859_s2 + $0xd0] sm:$0xff]  ;;  %v534_v25 = vld [vmem:[%s859_s2 + $0xc8] sm:$0xff]  ;;  %v533_v26 = vld [vmem:[%s859_s2 + $0xc0] sm:$0xff] }
  0x14   : > { %301 = vmatpush.msra.mxu1 %v290_v6  ;;  %340 = vmatpush.msra.mxu2 %v539_v20  ;;  %v532_v27 = vld [vmem:[%s859_s2 + $0xb8] sm:$0xff]  ;;  %v531_v28 = vld [vmem:[%s859_s2 + $0xb0] sm:$0xff]  ;;  %v530_v29 = vld [vmem:[%s859_s2 + $0xa8] sm:$0xff] }
  0x15   : > { %v529_v30 = vld [vmem:[%s859_s2 + $0xa0] sm:$0xff]  ;;  %v528_v31 = vld [vmem:[%s859_s2 + $0x98] sm:$0xff]  ;;  %v527_v37 = vld [vmem:[%s859_s2 + $0x90] sm:$0xff] }
  0x16   : > { %302 = vmatpush.msra.mxu1 %v289_v8  ;;  %341 = vmatpush.msra.mxu2 %v538_v21  ;;  %v568_v32 = vld [vmem:[%s860_s3] ss:$0 sm:$0xff]  ;;  %v526_v38 = vld [vmem:[%s859_s2 + $0x88] sm:$0xff]  ;;  %v556_v40 = vld [vmem:[%s859_s2 + $0x178] sm:$0xff] }
  0x17   : > { %v525_v39 = vld [vmem:[%s859_s2 + $0x80] sm:$0xff]  ;;  %v555_v41 = vld [vmem:[%s859_s2 + $0x170] sm:$0xff]  ;;  %381 = vmatpush.msra.mxu3 %v556_v40  ;;  %v554_v42 = vld [vmem:[%s859_s2 + $0x168] sm:$0xff] }
  0x18   : > { %303 = vmatpush.msra.mxu1 %v288_v9  ;;  %342 = vmatpush.msra.mxu2 %v537_v22  ;;  %v553_v43 = vld [vmem:[%s859_s2 + $0x160] sm:$0xff]  ;;  %v552_v44 = vld [vmem:[%s859_s2 + $0x158] sm:$0xff]  ;;  %v551_v45 = vld [vmem:[%s859_s2 + $0x150] sm:$0xff] }
  0x19   : > { %382 = vmatpush.msra.mxu3 %v555_v41  ;;  %v550_v46 = vld [vmem:[%s859_s2 + $0x148] sm:$0xff]  ;;  %v549_v47 = vld [vmem:[%s859_s2 + $0x140] sm:$0xff]  ;;  %v548_v48 = vld [vmem:[%s859_s2 + $0x138] sm:$0xff] }
  0x1a   : > { %304 = vmatpush.msra.mxu1 %v287_v10  ;;  %343 = vmatpush.msra.mxu2 %v536_v23  ;;  %v547_v49 = vld [vmem:[%s859_s2 + $0x130] sm:$0xff]  ;;  %v546_v50 = vld [vmem:[%s859_s2 + $0x128] sm:$0xff]  ;;  %v545_v51 = vld [vmem:[%s859_s2 + $0x120] sm:$0xff] }
  0x1b   : > { %383 = vmatpush.msra.mxu3 %v554_v42  ;;  %v544_v52 = vld [vmem:[%s859_s2 + $0x118] sm:$0xff]  ;;  %v569_v53 = vld [vmem:[%s860_s3 + $0x1] ss:$0 sm:$0xff]  ;;  %v543_v58 = vld [vmem:[%s859_s2 + $0x110] sm:$0xff] }
  0x1c   : > { %305 = vmatpush.msra.mxu1 %v286_v11  ;;  %344 = vmatpush.msra.mxu2 %v535_v24  ;;  %v542_v59 = vld [vmem:[%s859_s2 + $0x108] sm:$0xff]  ;;  %v541_v60 = vld [vmem:[%s859_s2 + $0x100] sm:$0xff]  ;;  %v419_v61 = vld [vmem:[%s861_s4 + $0x78] sm:$0xff] }
  0x1d   : > { %384 = vmatpush.msra.mxu3 %v553_v43  ;;  %v418_v62 = vld [vmem:[%s861_s4 + $0x70] sm:$0xff]  ;;  %424 = vmatpush.msrb.mxu0 %v419_v61  ;;  %v417_v63 = vld [vmem:[%s861_s4 + $0x68] sm:$0xff]  ;;  %v416_v0 = vld [vmem:[%s861_s4 + $0x60] sm:$0xff] }
  0x1e   : > { %306 = vmatpush.msra.mxu1 %v285_v12  ;;  %345 = vmatpush.msra.mxu2 %v534_v25  ;;  %v415_v1 = vld [vmem:[%s861_s4 + $0x58] sm:$0xff]  ;;  %v414_v2 = vld [vmem:[%s861_s4 + $0x50] sm:$0xff]  ;;  %v413_v3 = vld [vmem:[%s861_s4 + $0x48] sm:$0xff] }
  0x1f   : > { %385 = vmatpush.msra.mxu3 %v552_v44  ;;  %425 = vmatpush.msrb.mxu0 %v418_v62  ;;  %v412_v4 = vld [vmem:[%s861_s4 + $0x40] sm:$0xff]  ;;  %v411_v5 = vld [vmem:[%s861_s4 + $0x38] sm:$0xff]  ;;  %v410_v6 = vld [vmem:[%s861_s4 + $0x30] sm:$0xff] }
  0x20   : > { %307 = vmatpush.msra.mxu1 %v284_v13  ;;  %346 = vmatpush.msra.mxu2 %v533_v26  ;;  %v409_v7 = vld [vmem:[%s861_s4 + $0x28] sm:$0xff]  ;;  %v408_v8 = vld [vmem:[%s861_s4 + $0x20] sm:$0xff]  ;;  %v407_v9 = vld [vmem:[%s861_s4 + $0x18] sm:$0xff] }
  0x21   : > { %386 = vmatpush.msra.mxu3 %v551_v45  ;;  %426 = vmatpush.msrb.mxu0 %v417_v63  ;;  %v570_v10 = vld [vmem:[%s860_s3 + $0x2] ss:$0 sm:$0xff]  ;;  %v572_v23 = vld [vmem:[%s862_s5] ss:$0 sm:$0xff] }
  0x22   : > { %308 = vmatpush.msra.mxu1 %v283_v14  ;;  %347 = vmatpush.msra.mxu2 %v532_v27 }
  0x23   : > { %387 = vmatpush.msra.mxu3 %v550_v46  ;;  %427 = vmatpush.msrb.mxu0 %v416_v0 }
  0x24   : > { %309 = vmatpush.msra.mxu1 %v282_v15  ;;  %348 = vmatpush.msra.mxu2 %v531_v28  ;;  %v406_v15 = vld [vmem:[%s861_s4 + $0x10] sm:$0xff] }
  0x25   : > { %388 = vmatpush.msra.mxu3 %v549_v47  ;;  %428 = vmatpush.msrb.mxu0 %v415_v1 }
  0x26   : > { %310 = vmatpush.msra.mxu1 %v281_v16  ;;  %349 = vmatpush.msra.mxu2 %v530_v29  ;;  %v405_v16 = vld [vmem:[%s861_s4 + $0x8] sm:$0xff] }
  0x27   : > { %389 = vmatpush.msra.mxu3 %v548_v48  ;;  %429 = vmatpush.msrb.mxu0 %v414_v2 }
  0x28   : > { %311 = vmatpush.msra.mxu1 %v280_v17  ;;  %350 = vmatpush.msra.mxu2 %v529_v30  ;;  %v404_v17 = vld [vmem:[%s861_s4] sm:$0xff] }
  0x29   : > { %390 = vmatpush.msra.mxu3 %v547_v49  ;;  %430 = vmatpush.msrb.mxu0 %v413_v3 }
  0x2a   : > { %312 = vmatpush.msra.mxu1 %v279_v18  ;;  %351 = vmatpush.msra.mxu2 %v528_v31  ;;  %v571_v18 = vld [vmem:[%s860_s3 + $0x3] ss:$0 sm:$0xff] }
  0x2b   : > { %391 = vmatpush.msra.mxu3 %v546_v50  ;;  %431 = vmatpush.msrb.mxu0 %v412_v4 }
  0x2c   : > { %352 = vmatpush.msra.mxu2 %v527_v37 }
  0x2d   : > { %392 = vmatpush.msra.mxu3 %v545_v51  ;;  %432 = vmatpush.msrb.mxu0 %v411_v5 }
  0x2e   : > { %353 = vmatpush.msra.mxu2 %v526_v38 }
  0x2f   : > { %393 = vmatpush.msra.mxu3 %v544_v52  ;;  %433 = vmatpush.msrb.mxu0 %v410_v6 }
  0x30   : > { %354 = vmatpush.msra.mxu2 %v525_v39 }
  0x31   : > { %394 = vmatpush.msra.mxu3 %v543_v58  ;;  %434 = vmatpush.msrb.mxu0 %v409_v7 }
  0x33   : > { %395 = vmatpush.msra.mxu3 %v542_v59  ;;  %435 = vmatpush.msrb.mxu0 %v408_v8 }
  0x35   : > { %396 = vmatpush.msra.mxu3 %v541_v60  ;;  %436 = vmatpush.msrb.mxu0 %v407_v9 }
  0x37   : > { %437 = vmatpush.msrb.mxu0 %v406_v15 }
  0x39   : > { %438 = vmatpush.msrb.mxu0 %v405_v16 }
  0x3b   : > { %439 = vmatpush.msrb.mxu0 %v404_v17 }
  0x8c   : > { %v273_v33 = vpop.f32.mrf.mxu0 }
  0x8d   : > { %v274_v34 = vadd.f32 %v568_v32, %v273_v33 }
  0x8f   : > { %vm276_vm1 = vcmp.ge.f32.partialorder %v274_v34, 0.0  ;;  %v277_v35 = vmul.f32 0.1, %v274_v34 }
  0x91   : > { %v278_v36 = vsel %vm276_vm1, %v274_v34, %v277_v35 }
  0x92   : > { %313 = vmatmul.f32.vlgmr.msra.gmra.mxu1 %v278_v36 }
 0x10f   : > { %v314_v54 = vpop.f32.mrf.mxu1 }
 0x110   : > { %v315_v55 = vadd.f32 %v569_v53, %v314_v54 }
 0x112   : > { %vm317_vm2 = vcmp.ge.f32.partialorder %v315_v55, 0.0  ;;  %v318_v56 = vmul.f32 0.1, %v315_v55 }
 0x114   : > { %v319_v57 = vsel %vm317_vm2, %v315_v55, %v318_v56 }
 0x115   : > { %355 = vmatmul.f32.vlgmr.msra.gmra.mxu2 %v319_v57 }
 0x198   : > { %v356_v11 = vpop.f32.mrf.mxu2 }
 0x199   : > { %v357_v12 = vadd.f32 %v570_v10, %v356_v11 }
 0x19b   : > { %vm359_vm3 = vcmp.ge.f32.partialorder %v357_v12, 0.0  ;;  %v360_v13 = vmul.f32 0.1, %v357_v12 }
 0x19d   : > { %v361_v14 = vsel %vm359_vm3, %v357_v12, %v360_v13 }
 0x19e   : > { %397 = vmatmul.f32.vlgmr.msra.gmra.mxu3 %v361_v14 }
 0x221   : > { %v398_v19 = vpop.f32.mrf.mxu3 }
 0x222   : > { %v399_v20 = vadd.f32 %v571_v18, %v398_v19 }
 0x224   : > { %v402_v21 = vmul.f32 0.1, %v399_v20  ;;  %vm401_vm4 = vcmp.ge.f32.partialorder %v399_v20, 0.0 }
 0x226   : > { %v403_v22 = vsel %vm401_vm4, %v399_v20, %v402_v21 }
 0x227   : > { %440 = vmatmul.f32.vlgmr.msrb.gmra.mxu0 %v403_v22 }
 0x2a4   : > { %v441_v24 = vpop.f32.mrf.mxu0 }
 0x2a5   : > { %v442_v25 = vadd.f32 %v572_v23, %v441_v24 }
 0x2a7   : > { %v557_v26 = vmul.f32 -1.442695, %v442_v25 }
 0x2a9   : > { %573 = vpow2.f32 %v557_v26 }
 0x2af   : > { %v574_v27 = vpop.eup %573 }
 0x2b0   : > { %v447_v28 = vadd.f32 1.0, %v574_v27 }
 0x2b2   : > { %575 = vrcp.f32 %v447_v28  ;;  %v459_v32 = vand.u32 2147483648, %v447_v28  ;;  %v457_v34 = vand.u32 2147483647, %v447_v28  ;;  %vm453_vm6 = vweird.f32 %v447_v28 }
 0x2b4   : > { %v460_v36 = vor.u32 1.1754944e-38, %v459_v32  ;;  %vm458_vm8 = vcmp.eq.f32.partialorder %v457_v34, 8.507059e+37 }
 0x2b8   : > { %v576_v29 = vpop.eup %575 }
 0x2b9   : > { %v449_v30 = vmul.f32 %v576_v29, %v447_v28  ;;  %vm454_vm5 = vweird.f32 %v576_v29 }
 0x2ba   : > { %vm455_vm7 = vmor %vm453_vm6, %vm454_vm5 }
 0x2bb   : > { %v450_v31 = vsub.f32 1.0, %v449_v30 }
 0x2bd   : > { %v451_v33 = vmul.f32 %v576_v29, %v450_v31 }
 0x2bf   : > { %v452_v35 = vadd.f32 %v576_v29, %v451_v33 }
 0x2c1   : > { %v456_v37 = vsel %vm455_vm7, %v576_v29, %v452_v35 }
 0x2c2   : > { %v461_v38 = vsel %vm458_vm8, %v460_v36, %v456_v37 }
 0x2c3   : > { %463 = vst [vmem:[%s246_s23] sm:$0xff] %v461_v38 }
 0x2c4 PF: > { %s16_s21 = sadd.s32 1, %s583_s21  }
 0x2c5   : > { %p13_p4 = scmp.ge.s32.totalorder %s16_s21, 4  }
 0x2c7   :  { %15 = sbr.rel (!%p13_p4) target bundleno = 1 (0x1), region = 76 }

</bundles_post_ra>
